<compile_context>
chip_gen: v5e
topology: v5e:2x2
jax: 0.10.0
libtpu: 0.0.40
codegen_flags: <defaults>
</compile_context>

<pallas_src>
import functools

import jax
import jax.numpy as jnp
from jax import lax
from jax.experimental import pallas as pl
from jax.experimental.pallas import tpu as pltpu


# ------------------------------ small helpers -------------------------------- #

def _tree_sum(terms):
    """Sum a list of arrays with a balanced tree (no serial dependency chain)."""
    while len(terms) > 1:
        nxt = [terms[i] + terms[i + 1] for i in range(0, len(terms) - 1, 2)]
        if len(terms) % 2:
            nxt.append(terms[-1])
        terms = nxt
    return terms[0]


# ----------------------------- fused Pallas kernel -------------------------- #

def _fused_cnn_kernel(patches_ref, wmat_ref, cbias_ref, fcw_ref, fcb_ref,
                      conv_ref, pool_ref, fc_ref, *, n_batch, n_chan, k_img):
    """conv1(+bias) -> relu1 -> 2x2 maxpool -> fc, intermediates stay in vregs/VMEM.

    Column order of `patches`/`conv` is (dh, dw, n, ho, wo) so the 2x2 max-pool is
    an elementwise max of four 128-aligned lane slabs, and the pooled activations
    land in a (Cout, N*Ho*Wo) layout whose per-image lane blocks feed the fc
    contraction directly (no reshape / transpose / block-diagonal weight needed).
    """
    npool = n_batch * k_img                       # N * Ho*Wo (pool columns)

    # conv1: bf16 (Cout, Cin*9) @ bf16 (Cin*9, 4*N*Ho*Wo) -> f32, + bias.
    conv = jnp.dot(wmat_ref[...], patches_ref[...],
                   preferred_element_type=jnp.float32)
    conv = conv + cbias_ref[...]
    conv_ref[...] = conv                          # lane-dense (Cout, 512) f32

    # relu1 lives only in registers; the relu1 feature map is re-derived in the
    # XLA epilogue as max(conv1, 0) (saves one full output store, review item 5).
    r = jnp.maximum(conv, 0.0)

    # pool1: max over the 4 window-position slabs (each npool=128 lanes, aligned).
    p = jnp.maximum(jnp.maximum(r[:, 0 * npool:1 * npool], r[:, 1 * npool:2 * npool]),
                    jnp.maximum(r[:, 2 * npool:3 * npool], r[:, 3 * npool:4 * npool]))
    pool_ref[...] = p                             # lane-dense (Cout, N*Ho*Wo) f32

    # fc:  y[n, o] = sum_{c,kk} p[c, n*k + kk] * A[c, kk, o] + b[o]
    # Dense per-channel weight A (Cout, k, 128) — no block-diagonal, O(1) in batch.
    # Per-(channel, image) partials are independent small matmuls; the weight ref
    # is indexed directly (fcw_ref[c]) and partials are tree-summed.
    p16 = p.astype(jnp.bfloat16)
    partials = [[] for _ in range(n_batch)]
    for c in range(n_chan):                       # static (Cout = 8)
        a_c = fcw_ref[c]                          # (k, 128) bf16, loaded once per c
        for n in range(n_batch):                  # static (N = 2)
            lhs = p16[c:c + 1, n * k_img:(n + 1) * k_img]       # (1, k) lane slice
            partials[n].append(jnp.dot(lhs, a_c,
                                       preferred_element_type=jnp.float32))
    rows = [_tree_sum(partials[n]) + fcb_ref[...] for n in range(n_batch)]
    fc_ref[...] = jnp.concatenate(rows, axis=0)   # lane-dense (N, 128) f32


# --------------------------- host-side preparation --------------------------- #

def _im2col_pooled_order(x):
    """(N,Cin,H,W) -> bf16 (Cin*9, 4*N*Ho*Wo) patch matrix for a 3x3 'same' conv,
    with columns ordered (dh, dw, n, ho, wo) so 2x2 pool windows are lane slabs."""
    N, Cin, H, W = x.shape
    Ho, Wo = H // 2, W // 2
    xp = jnp.pad(x, ((0, 0), (0, 0), (1, 1), (1, 1)))
    taps = [xp[:, :, kh:kh + H, kw:kw + W] for kh in range(3) for kw in range(3)]
    t = jnp.stack(taps, axis=2)                       # (n, ci, j, h, w)
    t = t.reshape(N, Cin, 9, Ho, 2, Wo, 2)            # (n, ci, j, ho, dh, wo, dw)
    t = t.transpose(1, 2, 4, 6, 0, 3, 5)              # (ci, j, dh, dw, n, ho, wo)
    return t.reshape(Cin * 9, 4 * N * Ho * Wo).astype(jnp.bfloat16)


def prepare_params(conv_w, conv_b, fc_w, fc_b, *, Ho, Wo, fc_pad=128):
    """One-time weight re-layouts (done at init, never per forward call)."""
    Cout, Cin, KH, KW = conv_w.shape
    fc_out = fc_w.shape[0]
    k = Ho * Wo
    assert fc_out <= fc_pad, "fc padding scheme assumes fc_out <= 128"
    assert fc_w.shape[1] == Cout * k, "fc input size must be Cout*Ho*Wo"
    wmat = conv_w.reshape(Cout, Cin * KH * KW).astype(jnp.bfloat16)   # (Cout, 36)
    cbias = conv_b.reshape(Cout, 1).astype(jnp.float32)
    # Dense per-channel fc weight: A[c, kk, o] = fc_w[o, c*k + kk], padded to 128
    # output lanes.  (No block-diagonal over batch — O(1) in batch size.)
    A = fc_w.reshape(fc_out, Cout, k).transpose(1, 2, 0)              # (Cout, k, fc_out)
    A = jnp.pad(A, ((0, 0), (0, 0), (0, fc_pad - fc_out))).astype(jnp.bfloat16)
    fcb = jnp.pad(fc_b, (0, fc_pad - fc_out)).reshape(1, fc_pad).astype(jnp.float32)
    return wmat, cbias, A, fcb


def _forward_impl(x, wmat, cbias, fcw, fcb, *, Cout, fc_out, fc_pad=128):
    N, Cin, H, W = x.shape
    Ho, Wo = H // 2, W // 2
    k = Ho * Wo
    ncol = 4 * N * k              # conv columns (dh, dw, n, ho, wo)  -> 512
    npool = N * k                 # pool columns (n, ho, wo)          -> 128

    patches = _im2col_pooled_order(x)                 # bf16, XLA-fused glue

    kernel = functools.partial(_fused_cnn_kernel,
                               n_batch=N, n_chan=Cout, k_img=k)
    conv_p, pool_p, fc_p = pl.pallas_call(
        kernel,
        out_shape=(jax.ShapeDtypeStruct((Cout, ncol), jnp.float32),
                   jax.ShapeDtypeStruct((Cout, npool), jnp.float32),
                   jax.ShapeDtypeStruct((N, fc_pad), jnp.float32)),
        grid=(1,),
        in_specs=[pl.BlockSpec((Cin * 9, ncol), lambda i: (0, 0)),
                  pl.BlockSpec((Cout, Cin * 9), lambda i: (0, 0)),
                  pl.BlockSpec((Cout, 1), lambda i: (0, 0)),
                  pl.BlockSpec((Cout, k, fc_pad), lambda i: (0, 0, 0)),
                  pl.BlockSpec((1, fc_pad), lambda i: (0, 0))],
        out_specs=(pl.BlockSpec((Cout, ncol), lambda i: (0, 0)),
                   pl.BlockSpec((Cout, npool), lambda i: (0, 0)),
                   pl.BlockSpec((N, fc_pad), lambda i: (0, 0))),
        compiler_params=pltpu.CompilerParams(dimension_semantics=("arbitrary",)),
    )(patches, wmat, cbias, fcw, fcb)

    # One-shot boundary views back to the PyTorch NCHW layouts for the dict.
    def to_nchw(cols):                                # columns (dh, dw, n, ho, wo)
        t = cols.reshape(Cout, 2, 2, N, Ho, Wo)
        t = t.transpose(3, 0, 4, 1, 5, 2)             # (n, c, ho, dh, wo, dw)
        return t.reshape(N, Cout, H, W)

    conv1 = to_nchw(conv_p)
    relu1 = jnp.maximum(conv1, 0.0)                   # fused into the epilogue
    pool1 = pool_p.reshape(Cout, N, Ho, Wo).transpose(1, 0, 2, 3)
    fc = fc_p[:, :fc_out]                             # drop the 128-lane padding
    return {"conv1": conv1, "relu1": relu1, "pool1": pool1, "fc": fc}


# ------------------------------ submodule + port ----------------------------- #

class FusedCNN:
    """conv1(3x3,pad=1) -> relu1 -> MaxPool2d(2) -> fc, run as ONE jitted program
    containing a single fused Pallas kernel; returns every layer's output."""

    layer_names = ("conv1", "relu1", "pool1", "fc")

    def __init__(self, conv_w, conv_b, fc_w, fc_b, *, spatial):
        H, W = spatial
        assert H % 2 == 0 and W % 2 == 0, "pool layout assumes even H, W"
        self._Cout = int(conv_w.shape[0])
        self._fc_out = int(fc_w.shape[0])
        self._params = prepare_params(conv_w, conv_b, fc_w, fc_b,
                                      Ho=H // 2, Wo=W // 2)
        self._forward = jax.jit(functools.partial(
            _forward_impl, Cout=self._Cout, fc_out=self._fc_out))

    def forward_all(self, x):
        return self._forward(x, *self._params)


class FeatureExtractor:
    """JAX/Pallas port of draw_feature.FeatureExtractor (isres2net == False).

    Semantics match the torch module: layers run in order conv1->relu1->pool1->
    (view)->fc (the flatten before fc is folded into the fused fc weight layout),
    and a layer is kept iff extracted_layers is None, or its name is listed and
    does not contain 'fc'.
    """
    # TODO(synk): the per-layer print(name) side effect of the torch forward is omitted.

    def __init__(self, submodule, extracted_layers):
        self.submodule = submodule
        self.extracted_layers = extracted_layers

    def __call__(self, x):
        per_layer = self.submodule.forward_all(x)       # one fused pallas_call
        outputs = {}
        for name in self.submodule.layer_names:          # isres2net==False: no swap
            if self.extracted_layers is None or (
                name in self.extracted_layers and 'fc' not in name
            ):
                outputs[name] = per_layer[name]
        return outputs


# --------------------------------- main -------------------------------------- #

if __name__ == "__main__":
    key = jax.random.PRNGKey(0)
    kx, kw1, kb1, kwf, kbf = jax.random.split(key, 5)

    N, Cin, H, W = 2, 4, 16, 16
    Cout = 8
    fc_in = Cout * (H // 2) * (W // 2)   # 512
    fc_out = 10

    x = jax.random.normal(kx, (N, Cin, H, W), dtype=jnp.float32)
    conv_w = jax.random.normal(kw1, (Cout, Cin, 3, 3), dtype=jnp.float32) * 0.1
    conv_b = jax.random.normal(kb1, (Cout,), dtype=jnp.float32) * 0.1
    fc_w = jax.random.normal(kwf, (fc_out, fc_in), dtype=jnp.float32) * 0.05
    fc_b = jax.random.normal(kbf, (fc_out,), dtype=jnp.float32) * 0.05

    cnn = FusedCNN(conv_w, conv_b, fc_w, fc_b, spatial=(H, W))
    extractor = FeatureExtractor(cnn, extracted_layers=None)

    outs = extractor(x)
    outs = jax.tree_util.tree_map(jax.block_until_ready, outs)

    # Reference check against plain-JAX f32 ops (same semantics as the torch layers).
    # Tolerances are loosened because the kernel's matmul inputs are bf16.
    ref_conv = lax.conv_general_dilated(
        x, conv_w, window_strides=(1, 1), padding=((1, 1), (1, 1)),
        dimension_numbers=("NCHW", "OIHW", "NCHW")) + conv_b[None, :, None, None]
    ref_relu = jnp.maximum(ref_conv, 0.0)
    ref_pool = jnp.max(ref_relu.reshape(N, Cout, H // 2, 2, W // 2, 2), axis=(3, 5))
    ref_fc = ref_pool.reshape(N, -1) @ fc_w.T + fc_b

    assert outs["conv1"].shape == (N, Cout, H, W)
    assert outs["relu1"].shape == (N, Cout, H, W)
    assert outs["pool1"].shape == (N, Cout, H // 2, W // 2)
    assert outs["fc"].shape == (N, fc_out)
    assert jnp.allclose(outs["conv1"], ref_conv, atol=3e-2)
    assert jnp.allclose(outs["relu1"], ref_relu, atol=3e-2)
    assert jnp.allclose(outs["pool1"], ref_pool, atol=3e-2)
    assert jnp.allclose(outs["fc"], ref_fc, atol=5e-2)

    print("KERNEL_OK")
</pallas_src>

<mosaic_0001>
module attributes {stable_mosaic.version = 11 : i64} {
  func.func @_fused_cnn_kernel(%arg0: i32, %arg1: memref<36x512xbf16, #tpu.memory_space<vmem>>, %arg2: memref<8x36xbf16, #tpu.memory_space<vmem>>, %arg3: memref<8x1xf32, #tpu.memory_space<vmem>>, %arg4: memref<8x64x128xbf16, #tpu.memory_space<vmem>>, %arg5: memref<1x128xf32, #tpu.memory_space<vmem>>, %arg6: memref<8x512xf32, #tpu.memory_space<vmem>>, %arg7: memref<8x128xf32, #tpu.memory_space<vmem>>, %arg8: memref<2x128xf32, #tpu.memory_space<vmem>>) attributes {dimension_semantics = [#tpu.dimension_semantics<arbitrary>], iteration_bounds = array<i64: 1>, scalar_prefetch = 0 : i64, scratch_operands = 0 : i64, tpu.core_type = #tpu.core_type<tc>, window_params = [{pipeline_mode = #tpu.pipeline_mode<synchronous>, transform_indices = @transform_0, window_bounds = array<i64: 36, 512>}, {pipeline_mode = #tpu.pipeline_mode<synchronous>, transform_indices = @transform_1, window_bounds = array<i64: 8, 36>}, {pipeline_mode = #tpu.pipeline_mode<synchronous>, transform_indices = @transform_2, window_bounds = array<i64: 8, 1>}, {pipeline_mode = #tpu.pipeline_mode<synchronous>, transform_indices = @transform_3, window_bounds = array<i64: 8, 64, 128>}, {pipeline_mode = #tpu.pipeline_mode<synchronous>, transform_indices = @transform_4, window_bounds = array<i64: 1, 128>}, {pipeline_mode = #tpu.pipeline_mode<synchronous>, transform_indices = @transform_5, window_bounds = array<i64: 8, 512>}, {pipeline_mode = #tpu.pipeline_mode<synchronous>, transform_indices = @transform_6, window_bounds = array<i64: 8, 128>}, {pipeline_mode = #tpu.pipeline_mode<synchronous>, transform_indices = @transform_7, window_bounds = array<i64: 2, 128>}]} {
    %c0 = arith.constant 0 : index
    %c0_0 = arith.constant 0 : index
    %0 = vector.load %arg2[%c0, %c0_0] : memref<8x36xbf16, #tpu.memory_space<vmem>>, vector<8x36xbf16>
    %c0_1 = arith.constant 0 : index
    %c0_2 = arith.constant 0 : index
    %1 = vector.load %arg1[%c0_1, %c0_2] : memref<36x512xbf16, #tpu.memory_space<vmem>>, vector<36x512xbf16>
    %cst = arith.constant dense<0.000000e+00> : vector<8x512xf32>
    %2 = tpu.matmul %0, %1, %cst {dimension_numbers = #tpu.dot_dimension_numbers<[1], [0], [0], [1], [0, 0, 1, 1], [], []>} : vector<8x36xbf16>, vector<36x512xbf16>, vector<8x512xf32> -> vector<8x512xf32>
    %c0_3 = arith.constant 0 : index
    %c0_4 = arith.constant 0 : index
    %3 = vector.load %arg3[%c0_3, %c0_4] : memref<8x1xf32, #tpu.memory_space<vmem>>, vector<8x1xf32>
    %4 = vector.broadcast %3 : vector<8x1xf32> to vector<8x512xf32>
    %5 = arith.addf %2, %4 : vector<8x512xf32>
    %c0_5 = arith.constant 0 : index
    %c0_6 = arith.constant 0 : index
    %6 = vector.load %arg6[%c0_5, %c0_6] : memref<8x512xf32, #tpu.memory_space<vmem>>, vector<8x512xf32>
    tpu.vector_store %arg6[%c0_5, %c0_6], %5 {strides = array<i32>} : memref<8x512xf32, #tpu.memory_space<vmem>>, vector<8x512xf32>,
    %cst_7 = arith.constant 0.000000e+00 : f32
    %7 = vector.broadcast %cst_7 : f32 to vector<8x512xf32>
    %8 = arith.maximumf %5, %7 : vector<8x512xf32>
    %9 = vector.extract_strided_slice %8 {offsets = [0, 0], sizes = [8, 128], strides = [1, 1]} : vector<8x512xf32> to vector<8x128xf32>
    %10 = vector.extract_strided_slice %8 {offsets = [0, 128], sizes = [8, 128], strides = [1, 1]} : vector<8x512xf32> to vector<8x128xf32>
    %11 = arith.maximumf %9, %10 : vector<8x128xf32>
    %12 = vector.extract_strided_slice %8 {offsets = [0, 256], sizes = [8, 128], strides = [1, 1]} : vector<8x512xf32> to vector<8x128xf32>
    %13 = vector.extract_strided_slice %8 {offsets = [0, 384], sizes = [8, 128], strides = [1, 1]} : vector<8x512xf32> to vector<8x128xf32>
    %14 = arith.maximumf %12, %13 : vector<8x128xf32>
    %15 = arith.maximumf %11, %14 : vector<8x128xf32>
    %c0_8 = arith.constant 0 : index
    %c0_9 = arith.constant 0 : index
    %16 = vector.load %arg7[%c0_8, %c0_9] : memref<8x128xf32, #tpu.memory_space<vmem>>, vector<8x128xf32>
    tpu.vector_store %arg7[%c0_8, %c0_9], %15 {strides = array<i32>} : memref<8x128xf32, #tpu.memory_space<vmem>>, vector<8x128xf32>,
    %17 = arith.truncf %15 : vector<8x128xf32> to vector<8x128xbf16>
    %c0_10 = arith.constant 0 : index
    %c0_11 = arith.constant 0 : index
    %c0_12 = arith.constant 0 : index
    %18 = vector.load %arg4[%c0_10, %c0_11, %c0_12] : memref<8x64x128xbf16, #tpu.memory_space<vmem>>, vector<1x64x128xbf16>
    %19 = vector.shape_cast %18 : vector<1x64x128xbf16> to vector<64x128xbf16>
    %20 = vector.extract_strided_slice %17 {offsets = [0, 0], sizes = [1, 64], strides = [1, 1]} : vector<8x128xbf16> to vector<1x64xbf16>
    %cst_13 = arith.constant dense<0.000000e+00> : vector<1x128xf32>
    %21 = tpu.matmul %20, %19, %cst_13 {dimension_numbers = #tpu.dot_dimension_numbers<[1], [0], [0], [1], [0, 0, 1, 1], [], []>} : vector<1x64xbf16>, vector<64x128xbf16>, vector<1x128xf32> -> vector<1x128xf32>
    %22 = vector.extract_strided_slice %17 {offsets = [0, 64], sizes = [1, 64], strides = [1, 1]} : vector<8x128xbf16> to vector<1x64xbf16>
    %cst_14 = arith.constant dense<0.000000e+00> : vector<1x128xf32>
    %23 = tpu.matmul %22, %19, %cst_14 {dimension_numbers = #tpu.dot_dimension_numbers<[1], [0], [0], [1], [0, 0, 1, 1], [], []>} : vector<1x64xbf16>, vector<64x128xbf16>, vector<1x128xf32> -> vector<1x128xf32>
    %c1 = arith.constant 1 : index
    %c0_15 = arith.constant 0 : index
    %c0_16 = arith.constant 0 : index
    %24 = vector.load %arg4[%c1, %c0_15, %c0_16] : memref<8x64x128xbf16, #tpu.memory_space<vmem>>, vector<1x64x128xbf16>
    %25 = vector.shape_cast %24 : vector<1x64x128xbf16> to vector<64x128xbf16>
    %26 = vector.extract_strided_slice %17 {offsets = [1, 0], sizes = [1, 64], strides = [1, 1]} : vector<8x128xbf16> to vector<1x64xbf16>
    %cst_17 = arith.constant dense<0.000000e+00> : vector<1x128xf32>
    %27 = tpu.matmul %26, %25, %cst_17 {dimension_numbers = #tpu.dot_dimension_numbers<[1], [0], [0], [1], [0, 0, 1, 1], [], []>} : vector<1x64xbf16>, vector<64x128xbf16>, vector<1x128xf32> -> vector<1x128xf32>
    %28 = vector.extract_strided_slice %17 {offsets = [1, 64], sizes = [1, 64], strides = [1, 1]} : vector<8x128xbf16> to vector<1x64xbf16>
    %cst_18 = arith.constant dense<0.000000e+00> : vector<1x128xf32>
    %29 = tpu.matmul %28, %25, %cst_18 {dimension_numbers = #tpu.dot_dimension_numbers<[1], [0], [0], [1], [0, 0, 1, 1], [], []>} : vector<1x64xbf16>, vector<64x128xbf16>, vector<1x128xf32> -> vector<1x128xf32>
    %c2 = arith.constant 2 : index
    %c0_19 = arith.constant 0 : index
    %c0_20 = arith.constant 0 : index
    %30 = vector.load %arg4[%c2, %c0_19, %c0_20] : memref<8x64x128xbf16, #tpu.memory_space<vmem>>, vector<1x64x128xbf16>
    %31 = vector.shape_cast %30 : vector<1x64x128xbf16> to vector<64x128xbf16>
    %32 = vector.extract_strided_slice %17 {offsets = [2, 0], sizes = [1, 64], strides = [1, 1]} : vector<8x128xbf16> to vector<1x64xbf16>
    %cst_21 = arith.constant dense<0.000000e+00> : vector<1x128xf32>
    %33 = tpu.matmul %32, %31, %cst_21 {dimension_numbers = #tpu.dot_dimension_numbers<[1], [0], [0], [1], [0, 0, 1, 1], [], []>} : vector<1x64xbf16>, vector<64x128xbf16>, vector<1x128xf32> -> vector<1x128xf32>
    %34 = vector.extract_strided_slice %17 {offsets = [2, 64], sizes = [1, 64], strides = [1, 1]} : vector<8x128xbf16> to vector<1x64xbf16>
    %cst_22 = arith.constant dense<0.000000e+00> : vector<1x128xf32>
    %35 = tpu.matmul %34, %31, %cst_22 {dimension_numbers = #tpu.dot_dimension_numbers<[1], [0], [0], [1], [0, 0, 1, 1], [], []>} : vector<1x64xbf16>, vector<64x128xbf16>, vector<1x128xf32> -> vector<1x128xf32>
    %c3 = arith.constant 3 : index
    %c0_23 = arith.constant 0 : index
    %c0_24 = arith.constant 0 : index
    %36 = vector.load %arg4[%c3, %c0_23, %c0_24] : memref<8x64x128xbf16, #tpu.memory_space<vmem>>, vector<1x64x128xbf16>
    %37 = vector.shape_cast %36 : vector<1x64x128xbf16> to vector<64x128xbf16>
    %38 = vector.extract_strided_slice %17 {offsets = [3, 0], sizes = [1, 64], strides = [1, 1]} : vector<8x128xbf16> to vector<1x64xbf16>
    %cst_25 = arith.constant dense<0.000000e+00> : vector<1x128xf32>
    %39 = tpu.matmul %38, %37, %cst_25 {dimension_numbers = #tpu.dot_dimension_numbers<[1], [0], [0], [1], [0, 0, 1, 1], [], []>} : vector<1x64xbf16>, vector<64x128xbf16>, vector<1x128xf32> -> vector<1x128xf32>
    %40 = vector.extract_strided_slice %17 {offsets = [3, 64], sizes = [1, 64], strides = [1, 1]} : vector<8x128xbf16> to vector<1x64xbf16>
    %cst_26 = arith.constant dense<0.000000e+00> : vector<1x128xf32>
    %41 = tpu.matmul %40, %37, %cst_26 {dimension_numbers = #tpu.dot_dimension_numbers<[1], [0], [0], [1], [0, 0, 1, 1], [], []>} : vector<1x64xbf16>, vector<64x128xbf16>, vector<1x128xf32> -> vector<1x128xf32>
    %c4 = arith.constant 4 : index
    %c0_27 = arith.constant 0 : index
    %c0_28 = arith.constant 0 : index
    %42 = vector.load %arg4[%c4, %c0_27, %c0_28] : memref<8x64x128xbf16, #tpu.memory_space<vmem>>, vector<1x64x128xbf16>
    %43 = vector.shape_cast %42 : vector<1x64x128xbf16> to vector<64x128xbf16>
    %44 = vector.extract_strided_slice %17 {offsets = [4, 0], sizes = [1, 64], strides = [1, 1]} : vector<8x128xbf16> to vector<1x64xbf16>
    %cst_29 = arith.constant dense<0.000000e+00> : vector<1x128xf32>
    %45 = tpu.matmul %44, %43, %cst_29 {dimension_numbers = #tpu.dot_dimension_numbers<[1], [0], [0], [1], [0, 0, 1, 1], [], []>} : vector<1x64xbf16>, vector<64x128xbf16>, vector<1x128xf32> -> vector<1x128xf32>
    %46 = vector.extract_strided_slice %17 {offsets = [4, 64], sizes = [1, 64], strides = [1, 1]} : vector<8x128xbf16> to vector<1x64xbf16>
    %cst_30 = arith.constant dense<0.000000e+00> : vector<1x128xf32>
    %47 = tpu.matmul %46, %43, %cst_30 {dimension_numbers = #tpu.dot_dimension_numbers<[1], [0], [0], [1], [0, 0, 1, 1], [], []>} : vector<1x64xbf16>, vector<64x128xbf16>, vector<1x128xf32> -> vector<1x128xf32>
    %c5 = arith.constant 5 : index
    %c0_31 = arith.constant 0 : index
    %c0_32 = arith.constant 0 : index
    %48 = vector.load %arg4[%c5, %c0_31, %c0_32] : memref<8x64x128xbf16, #tpu.memory_space<vmem>>, vector<1x64x128xbf16>
    %49 = vector.shape_cast %48 : vector<1x64x128xbf16> to vector<64x128xbf16>
    %50 = vector.extract_strided_slice %17 {offsets = [5, 0], sizes = [1, 64], strides = [1, 1]} : vector<8x128xbf16> to vector<1x64xbf16>
    %cst_33 = arith.constant dense<0.000000e+00> : vector<1x128xf32>
    %51 = tpu.matmul %50, %49, %cst_33 {dimension_numbers = #tpu.dot_dimension_numbers<[1], [0], [0], [1], [0, 0, 1, 1], [], []>} : vector<1x64xbf16>, vector<64x128xbf16>, vector<1x128xf32> -> vector<1x128xf32>
    %52 = vector.extract_strided_slice %17 {offsets = [5, 64], sizes = [1, 64], strides = [1, 1]} : vector<8x128xbf16> to vector<1x64xbf16>
    %cst_34 = arith.constant dense<0.000000e+00> : vector<1x128xf32>
    %53 = tpu.matmul %52, %49, %cst_34 {dimension_numbers = #tpu.dot_dimension_numbers<[1], [0], [0], [1], [0, 0, 1, 1], [], []>} : vector<1x64xbf16>, vector<64x128xbf16>, vector<1x128xf32> -> vector<1x128xf32>
    %c6 = arith.constant 6 : index
    %c0_35 = arith.constant 0 : index
    %c0_36 = arith.constant 0 : index
    %54 = vector.load %arg4[%c6, %c0_35, %c0_36] : memref<8x64x128xbf16, #tpu.memory_space<vmem>>, vector<1x64x128xbf16>
    %55 = vector.shape_cast %54 : vector<1x64x128xbf16> to vector<64x128xbf16>
    %56 = vector.extract_strided_slice %17 {offsets = [6, 0], sizes = [1, 64], strides = [1, 1]} : vector<8x128xbf16> to vector<1x64xbf16>
    %cst_37 = arith.constant dense<0.000000e+00> : vector<1x128xf32>
    %57 = tpu.matmul %56, %55, %cst_37 {dimension_numbers = #tpu.dot_dimension_numbers<[1], [0], [0], [1], [0, 0, 1, 1], [], []>} : vector<1x64xbf16>, vector<64x128xbf16>, vector<1x128xf32> -> vector<1x128xf32>
    %58 = vector.extract_strided_slice %17 {offsets = [6, 64], sizes = [1, 64], strides = [1, 1]} : vector<8x128xbf16> to vector<1x64xbf16>
    %cst_38 = arith.constant dense<0.000000e+00> : vector<1x128xf32>
    %59 = tpu.matmul %58, %55, %cst_38 {dimension_numbers = #tpu.dot_dimension_numbers<[1], [0], [0], [1], [0, 0, 1, 1], [], []>} : vector<1x64xbf16>, vector<64x128xbf16>, vector<1x128xf32> -> vector<1x128xf32>
    %c7 = arith.constant 7 : index
    %c0_39 = arith.constant 0 : index
    %c0_40 = arith.constant 0 : index
    %60 = vector.load %arg4[%c7, %c0_39, %c0_40] : memref<8x64x128xbf16, #tpu.memory_space<vmem>>, vector<1x64x128xbf16>
    %61 = vector.shape_cast %60 : vector<1x64x128xbf16> to vector<64x128xbf16>
    %62 = vector.extract_strided_slice %17 {offsets = [7, 0], sizes = [1, 64], strides = [1, 1]} : vector<8x128xbf16> to vector<1x64xbf16>
    %cst_41 = arith.constant dense<0.000000e+00> : vector<1x128xf32>
    %63 = tpu.matmul %62, %61, %cst_41 {dimension_numbers = #tpu.dot_dimension_numbers<[1], [0], [0], [1], [0, 0, 1, 1], [], []>} : vector<1x64xbf16>, vector<64x128xbf16>, vector<1x128xf32> -> vector<1x128xf32>
    %64 = vector.extract_strided_slice %17 {offsets = [7, 64], sizes = [1, 64], strides = [1, 1]} : vector<8x128xbf16> to vector<1x64xbf16>
    %cst_42 = arith.constant dense<0.000000e+00> : vector<1x128xf32>
    %65 = tpu.matmul %64, %61, %cst_42 {dimension_numbers = #tpu.dot_dimension_numbers<[1], [0], [0], [1], [0, 0, 1, 1], [], []>} : vector<1x64xbf16>, vector<64x128xbf16>, vector<1x128xf32> -> vector<1x128xf32>
    %66 = arith.addf %21, %27 : vector<1x128xf32>
    %67 = arith.addf %33, %39 : vector<1x128xf32>
    %68 = arith.addf %45, %51 : vector<1x128xf32>
    %69 = arith.addf %57, %63 : vector<1x128xf32>
    %70 = arith.addf %66, %67 : vector<1x128xf32>
    %71 = arith.addf %68, %69 : vector<1x128xf32>
    %72 = arith.addf %70, %71 : vector<1x128xf32>
    %c0_43 = arith.constant 0 : index
    %c0_44 = arith.constant 0 : index
    %73 = vector.load %arg5[%c0_43, %c0_44] : memref<1x128xf32, #tpu.memory_space<vmem>>, vector<1x128xf32>
    %74 = arith.addf %72, %73 : vector<1x128xf32>
    %75 = arith.addf %23, %29 : vector<1x128xf32>
    %76 = arith.addf %35, %41 : vector<1x128xf32>
    %77 = arith.addf %47, %53 : vector<1x128xf32>
    %78 = arith.addf %59, %65 : vector<1x128xf32>
    %79 = arith.addf %75, %76 : vector<1x128xf32>
    %80 = arith.addf %77, %78 : vector<1x128xf32>
    %81 = arith.addf %79, %80 : vector<1x128xf32>
    %c0_45 = arith.constant 0 : index
    %c0_46 = arith.constant 0 : index
    %82 = vector.load %arg5[%c0_45, %c0_46] : memref<1x128xf32, #tpu.memory_space<vmem>>, vector<1x128xf32>
    %83 = arith.addf %81, %82 : vector<1x128xf32>
    %84 = tpu.concatenate %74, %83 in 0 : vector<1x128xf32>, vector<1x128xf32> -> vector<2x128xf32>
    %c0_47 = arith.constant 0 : index
    %c0_48 = arith.constant 0 : index
    %85 = vector.load %arg8[%c0_47, %c0_48] : memref<2x128xf32, #tpu.memory_space<vmem>>, vector<2x128xf32>
    tpu.vector_store %arg8[%c0_47, %c0_48], %84 {strides = array<i32>} : memref<2x128xf32, #tpu.memory_space<vmem>>, vector<2x128xf32>,
    return
  }
  func.func @transform_0(%arg0: i32) -> (i32, i32) {
    %c0_i32 = arith.constant 0 : i32
    %c0_i32_0 = arith.constant 0 : i32
    %c0_i32_1 = arith.constant 0 : i32
    return %c0_i32, %c0_i32_0 : i32, i32
  }
  func.func @transform_1(%arg0: i32) -> (i32, i32) {
    %c0_i32 = arith.constant 0 : i32
    %c0_i32_0 = arith.constant 0 : i32
    %c0_i32_1 = arith.constant 0 : i32
    return %c0_i32, %c0_i32_0 : i32, i32
  }
  func.func @transform_2(%arg0: i32) -> (i32, i32) {
    %c0_i32 = arith.constant 0 : i32
    %c0_i32_0 = arith.constant 0 : i32
    %c0_i32_1 = arith.constant 0 : i32
    return %c0_i32, %c0_i32_0 : i32, i32
  }
  func.func @transform_3(%arg0: i32) -> (i32, i32, i32) {
    %c0_i32 = arith.constant 0 : i32
    %c0_i32_0 = arith.constant 0 : i32
    %c0_i32_1 = arith.constant 0 : i32
    %c0_i32_2 = arith.constant 0 : i32
    return %c0_i32, %c0_i32_0, %c0_i32_1 : i32, i32, i32
  }
  func.func @transform_4(%arg0: i32) -> (i32, i32) {
    %c0_i32 = arith.constant 0 : i32
    %c0_i32_0 = arith.constant 0 : i32
    %c0_i32_1 = arith.constant 0 : i32
    return %c0_i32, %c0_i32_0 : i32, i32
  }
  func.func @transform_5(%arg0: i32) -> (i32, i32) {
    %c0_i32 = arith.constant 0 : i32
    %c0_i32_0 = arith.constant 0 : i32
    %c0_i32_1 = arith.constant 0 : i32
    return %c0_i32, %c0_i32_0 : i32, i32
  }
  func.func @transform_6(%arg0: i32) -> (i32, i32) {
    %c0_i32 = arith.constant 0 : i32
    %c0_i32_0 = arith.constant 0 : i32
    %c0_i32_1 = arith.constant 0 : i32
    return %c0_i32, %c0_i32_0 : i32, i32
  }
  func.func @transform_7(%arg0: i32) -> (i32, i32) {
    %c0_i32 = arith.constant 0 : i32
    %c0_i32_0 = arith.constant 0 : i32
    %c0_i32_1 = arith.constant 0 : i32
    return %c0_i32, %c0_i32_0 : i32, i32
  }
}

</mosaic_0001>

<bundles_post_ra>
// kernel: _forward_impl.1
= control target key start
LH: loop header
LB: loop body
LE: loop exit
PB: predicated region body
PF: predicated region fallthrough
CT: control target
= control target key end

     0   :  { %vm96_vm0 = vcmask 1041408   ;;  %s1326_s0 = inlined_call_operand.vmem [shape: bf16[36,512], index: 0, kind: input, shape index: {}]   ;;  %s1327_s1 = inlined_call_operand.vmem [shape: bf16[8,36], index: 1, kind: input, shape index: {}]   ;;  %s1328_s2 = inlined_call_operand.vmem [shape: f32[8,1], index: 2, kind: input, shape index: {}]   ;;  %s1329_s3 = inlined_call_operand.vmem [shape: bf16[8,64,128], index: 3, kind: input, shape index: {}]   ;;  %s1330_s4 = inlined_call_operand.vmem [shape: f32[1,128], index: 4, kind: input, shape index: {}]   ;;  %s1331_s5 = inlined_call_operand.vmem [shape: f32[8,512], index: 5, kind: output, shape index: {0}]   ;;  %s1332_s6 = inlined_call_operand.vmem [shape: f32[8,128], index: 6, kind: output, shape index: {1}]   ;;  %s1333_s7 = inlined_call_operand.hbm [shape: f32[2,128], index: 7, kind: output, shape index: {2}]  }
   0x1   :  { %v34_v0 = vld [vmem:[%s1326_s0 + $0x40] sm:$0x33]  ;;  %v35_v1 = vld [vmem:[%s1326_s0 + $0x48] sm:$0x33]  ;;  %v1003_v7 = vld [vmem:[%s1326_s0 + $0x2c] sm:$0xf0] }
   0x2   :  { %v68_v2 = vunpack.c.l.b16 %v34_v0  ;;  %v69_v3 = vunpack.c.h.b16 %v34_v0  ;;  %v70_v4 = vunpack.c.l.b16 %v35_v1  ;;  %v71_v5 = vunpack.c.h.b16 %v35_v1  ;;  %v779_v6 = vld [vmem:[%s1326_s0 + $0x20] sm:$0xf]  ;;  %v1001_v12 = vld [vmem:[%s1326_s0 + $0x24] sm:$0xf]  ;;  %v781_v13 = vld [vmem:[%s1326_s0 + $0x30] sm:$0xf0] }
   0x3   :  { %v787_v14 = vld [vmem:[%s1326_s0 + $0x28] sm:$0xf]  ;;  %v1004_v15 = vld [vmem:[%s1326_s0 + $0x34] sm:$0xf0]  ;;  %v1002_v16 = vld [vmem:[%s1326_s0 + $0x2c] sm:$0xf]  ;;  %v780_v23 = vor.u32 %v1003_v7, %v779_v6  ;;  %v784_v24 = vor.u32 %v1001_v12, %v781_v13 }
   0x4   :  { %v80_v8 = vpack.c.b16 %v68_v2, %v68_v2  ;;  %v81_v9 = vpack.c.b16 %v69_v3, %v69_v3  ;;  %v82_v10 = vpack.c.b16 %v70_v4, %v70_v4  ;;  %v83_v11 = vpack.c.b16 %v71_v5, %v71_v5  ;;  %v789_v17 = vld [vmem:[%s1326_s0 + $0x38] sm:$0xf0]  ;;  %v763_v22 = vld [vmem:[%s1326_s0] sm:$0xf]  ;;  %v999_v25 = vld [vmem:[%s1326_s0 + $0xc] sm:$0xf0] }
   0x5   :  { %v997_v26 = vld [vmem:[%s1326_s0 + $0x4] sm:$0xf]  ;;  %v765_v27 = vld [vmem:[%s1326_s0 + $0x10] sm:$0xf0]  ;;  %v788_v28 = vor.u32 %v1004_v15, %v787_v14  ;;  %v792_v29 = vor.u32 %v1002_v16, %v789_v17  ;;  %v771_v30 = vld [vmem:[%s1326_s0 + $0x8] sm:$0xf] }
   0x6   :  { %v98_v18 = vsel %vm96_vm0, %v80_v8, 0  ;;  %v101_v19 = vsel %vm96_vm0, %v81_v9, 0  ;;  %v104_v20 = vsel %vm96_vm0, %v82_v10, 0  ;;  %v107_v21 = vsel %vm96_vm0, %v83_v11, 0  ;;  %v36_v31 = vld [vmem:[%s1328_s2] sm:$0xff] }
   0x7   :  { %114 = vmatpush.bf16.msra.mxu0 %v98_v18  ;;  %127 = vmatpush.bf16.msra.mxu1 %v101_v19 }
   0x8   :  { %140 = vmatpush.bf16.msra.mxu2 %v104_v20  ;;  %153 = vmatpush.bf16.msra.mxu3 %v107_v21 }
   0x9   :  { %13 = vsyncpa [#allocation3], 0  ;;  %v1000_v32 = vld [vmem:[%s1326_s0 + $0x14] sm:$0xf0]  ;;  %v998_v33 = vld [vmem:[%s1326_s0 + $0xc] sm:$0xf]  ;;  %v764_v36 = vor.u32 %v999_v25, %v763_v22  ;;  %v768_v37 = vor.u32 %v997_v26, %v765_v27 }
   0xa   :  { %v773_v34 = vld [vmem:[%s1326_s0 + $0x18] sm:$0xf0]  ;;  %v1067_v35 = vmov 0   ;;  %v772_v38 = vor.u32 %v1000_v32, %v771_v30  ;;  %v25_v40 = vld [vmem:[%s1327_s1] sm:$0xf]  ;;  %vm92_vm1 = vcmask 293888  }
   0xb   :  { %1040 = vset.pattern.permute.xlu0 %v1067_v35  ;;  %115 = vmatpush.bf16.msra.mxu0 %v780_v23  ;;  %v776_v39 = vor.u32 %v998_v33, %v773_v34  ;;  %v1012_v41 = vld [vmem:[%s1329_s3 + $0x38] sm:$0xff]  ;;  %v1011_v43 = vld [vmem:[%s1329_s3 + $0x30] sm:$0xff]  ;;  %v1010_v45 = vld [vmem:[%s1329_s3 + $0x28] sm:$0xff]  ;;  %vm221_vm2 = vcmask 523264   ;;  %s1069_s12 = smov [#allocation2]   ;;  %s748_s2 = sshll.u32 %s1333_s7, 4  ;;  %s749_s2 = int_to_ptr.hbm [resolvable:$true] %s748_s2 }
   0xc   :  { %39 = vperm.xlu0 %1040, %v36_v31   ;;  %128 = vmatpush.bf16.msra.mxu1 %v784_v24  ;;  %v1020_v42 = vld [vmem:[%s1329_s3 + $0x78] sm:$0xff]  ;;  %v1019_v44 = vld [vmem:[%s1329_s3 + $0x70] sm:$0xff]  ;;  %v1018_v46 = vld [vmem:[%s1329_s3 + $0x68] sm:$0xff]  ;;  %s746_s13 = sshll.u32 %s1069_s12, 4  ;;  %vm734_vm3 = vcmask 1040384   ;;  %s747_s13 = int_to_ptr.vmem [resolvable:$true] %s746_s13 }
   0xd   :  { %141 = vmatpush.bf16.msra.mxu2 %v788_v28  ;;  %154 = vmatpush.bf16.msra.mxu3 %v792_v29  ;;  %v1009_v47 = vld [vmem:[%s1329_s3 + $0x20] sm:$0xff]  ;;  %v1028_v49 = vld [vmem:[%s1329_s3 + $0xb8] sm:$0xff]  ;;  %v1027_v51 = vld [vmem:[%s1329_s3 + $0xb0] sm:$0xff] }
   0xe   :  { %v1017_v48 = vld [vmem:[%s1329_s3 + $0x60] sm:$0xff]  ;;  %v1036_v50 = vld [vmem:[%s1329_s3 + $0xf8] sm:$0xff]  ;;  %v1035_v52 = vld [vmem:[%s1329_s3 + $0xf0] sm:$0xff] }
   0xf   :  { %116 = vmatpush.bf16.msra.mxu0 %v764_v36  ;;  %v1026_v56 = vld [vmem:[%s1329_s3 + $0xa8] sm:$0xff]  ;;  %v1025_v60 = vld [vmem:[%s1329_s3 + $0xa0] sm:$0xff]  ;;  %v1008_v16 = vld [vmem:[%s1329_s3 + $0x18] sm:$0xff] }
  0x10   :  { %129 = vmatpush.bf16.msra.mxu1 %v768_v37  ;;  %v1034_v59 = vld [vmem:[%s1329_s3 + $0xe8] sm:$0xff]  ;;  %v1033_v61 = vld [vmem:[%s1329_s3 + $0xe0] sm:$0xff]  ;;  %v1024_v20 = vld [vmem:[%s1329_s3 + $0x98] sm:$0xff] }
  0x11   :  { %142 = vmatpush.bf16.msra.mxu2 %v772_v38  ;;  %155 = vmatpush.bf16.msra.mxu3 %v776_v39  ;;  %v1007_v21 = vld [vmem:[%s1329_s3 + $0x10] sm:$0xff]  ;;  %v1006_v23 = vld [vmem:[%s1329_s3 + $0x8] sm:$0xff]  ;;  %v1005_v28 = vld [vmem:[%s1329_s3] sm:$0xff] }
  0x12   :  { %793 = vmatmul.msk.bf16.vlgmr.msra.gmra.mxu0 %vm92_vm1, %v25_v40  ;;  %v1023_v22 = vld [vmem:[%s1329_s3 + $0x90] sm:$0xff]  ;;  %v1022_v27 = vld [vmem:[%s1329_s3 + $0x88] sm:$0xff]  ;;  %v1021_v29 = vld [vmem:[%s1329_s3 + $0x80] sm:$0xff] }
  0x13   :  { %794 = vmatmul.msk.bf16.vlgmr.msra.gmra.mxu1 %vm92_vm1, %v25_v40  ;;  %229 = vmatpush.bf16.msrb.mxu0 %v1012_v41  ;;  %v1016_v33 = vld [vmem:[%s1329_s3 + $0x58] sm:$0xff]  ;;  %v1015_v37 = vld [vmem:[%s1329_s3 + $0x50] sm:$0xff]  ;;  %v1014_v39 = vld [vmem:[%s1329_s3 + $0x48] sm:$0xff] }
  0x14   :  { %795 = vmatmul.msk.bf16.vlgmr.msra.gmra.mxu2 %vm92_vm1, %v25_v40  ;;  %796 = vmatmul.msk.bf16.vlgmr.msra.gmra.mxu3 %vm92_vm1, %v25_v40  ;;  %v1032_v35 = vld [vmem:[%s1329_s3 + $0xd8] sm:$0xff]  ;;  %v1031_v38 = vld [vmem:[%s1329_s3 + $0xd0] sm:$0xff] }
  0x15   :  { %247 = vmatpush.bf16.msrb.mxu1 %v1012_v41  ;;  %306 = vmatpush.bf16.msrb.mxu2 %v1020_v42  ;;  %v1030_v41 = vld [vmem:[%s1329_s3 + $0xc8] sm:$0xff] }
  0x16   :  { %324 = vmatpush.bf16.msrb.mxu3 %v1020_v42  ;;  %v1013_v42 = vld [vmem:[%s1329_s3 + $0x40] sm:$0xff] }
  0x17   :  { %230 = vmatpush.bf16.msrb.mxu0 %v1011_v43 }
  0x19   :  { %248 = vmatpush.bf16.msrb.mxu1 %v1011_v43  ;;  %307 = vmatpush.bf16.msrb.mxu2 %v1019_v44 }
  0x1a   :  { %325 = vmatpush.bf16.msrb.mxu3 %v1019_v44  ;;  %v1029_v44 = vld [vmem:[%s1329_s3 + $0xc0] sm:$0xff] }
  0x1b   :  { %231 = vmatpush.bf16.msrb.mxu0 %v1010_v45 }
  0x1d   :  { %249 = vmatpush.bf16.msrb.mxu1 %v1010_v45  ;;  %308 = vmatpush.bf16.msrb.mxu2 %v1018_v46 }
  0x1e   :  { %326 = vmatpush.bf16.msrb.mxu3 %v1018_v46 }
  0x1f   :  { %232 = vmatpush.bf16.msrb.mxu0 %v1009_v47 }
  0x21   :  { %250 = vmatpush.bf16.msrb.mxu1 %v1009_v47  ;;  %309 = vmatpush.bf16.msrb.mxu2 %v1017_v48 }
  0x22   :  { %327 = vmatpush.bf16.msrb.mxu3 %v1017_v48 }
  0x23   :  { %383 = vmatpush.bf16.msra.mxu0 %v1028_v49 }
  0x25   :  { %401 = vmatpush.bf16.msra.mxu1 %v1028_v49  ;;  %460 = vmatpush.bf16.msra.mxu2 %v1036_v50 }
  0x26   :  { %478 = vmatpush.bf16.msra.mxu3 %v1036_v50 }
  0x27   :  { %384 = vmatpush.bf16.msra.mxu0 %v1027_v51 }
  0x29   :  { %402 = vmatpush.bf16.msra.mxu1 %v1027_v51  ;;  %461 = vmatpush.bf16.msra.mxu2 %v1035_v52 }
  0x2a   :  { %479 = vmatpush.bf16.msra.mxu3 %v1035_v52 }
  0x2b   :  { %385 = vmatpush.bf16.msra.mxu0 %v1026_v56 }
  0x2d   :  { %403 = vmatpush.bf16.msra.mxu1 %v1026_v56  ;;  %462 = vmatpush.bf16.msra.mxu2 %v1034_v59 }
  0x2e   :  { %480 = vmatpush.bf16.msra.mxu3 %v1034_v59 }
  0x2f   :  { %386 = vmatpush.bf16.msra.mxu0 %v1025_v60 }
  0x31   :  { %404 = vmatpush.bf16.msra.mxu1 %v1025_v60  ;;  %463 = vmatpush.bf16.msra.mxu2 %v1033_v61 }
  0x32   :  { %481 = vmatpush.bf16.msra.mxu3 %v1033_v61 }
  0x7e   :  { %v40_v53 = vpop.permute.xlu0 %39 }
  0x8f   :  { %v118_v54 = vpop.f32.mrf.mxu0 }
  0x90   :  { %v131_v55 = vpop.f32.mrf.mxu1  ;;  %v119_v57 = vadd.f32 %v118_v54, %v40_v53 }
  0x91   :  { %v132_v58 = vadd.f32 %v131_v55, %v40_v53 }
  0x92   :  { %161 = vst [vmem:[%s1331_s5] sm:$0xff] %v119_v57  ;;  %v165_v62 = vmax.f32 %v119_v57, 0.0 }
  0x93   :  { %162 = vst [vmem:[%s1331_s5 + $0x8] sm:$0xff] %v132_v58  ;;  %v166_v63 = vmax.f32 %v132_v58, 0.0 }
  0x95   :  { %v169_v8 = vmax.f32 %v165_v62, %v166_v63 }
  0x97   :  { %v144_v0 = vpop.f32.mrf.mxu2  ;;  %v157_v1 = vpop.f32.mrf.mxu3 }
  0x98   :  { %v145_v2 = vadd.f32 %v144_v0, %v40_v53  ;;  %v158_v3 = vadd.f32 %v157_v1, %v40_v53  ;;  %v120_v4 = vpop.f32.mrf.mxu0  ;;  %v133_v5 = vpop.f32.mrf.mxu1 }
  0x9a   :  { %163 = vst [vmem:[%s1331_s5 + $0x10] sm:$0xff] %v145_v2  ;;  %v167_v6 = vmax.f32 %v145_v2, 0.0  ;;  %v168_v7 = vmax.f32 %v158_v3, 0.0 }
  0x9b   :  { %164 = vst [vmem:[%s1331_s5 + $0x18] sm:$0xff] %v158_v3  ;;  %s1068_s5 = smov 64  }
  0x9c   :  { %v170_v9 = vmax.f32 %v167_v6, %v168_v7 }
  0x9e   :  { %v171_v10 = vmax.f32 %v169_v8, %v170_v9 }
  0x9f   :  { %v146_v11 = vpop.f32.mrf.mxu2  ;;  %v159_v12 = vpop.f32.mrf.mxu3 }
  0xa0   :  { %172 = vst [vmem:[%s1332_s6] sm:$0xff] %v171_v10  ;;  %v173_v13 = vpack.c.bf16 %v171_v10, %v171_v10 }
  0xa2   :  { %v192_v14 = vunpack.c.l.b16 %v173_v13 }
  0xa4   :  { %v1237_v15 = vpack.c.b16 %v192_v14, %v192_v14 }
  0xa6   :  { %v195_v17 = vshrl.u32 %v1237_v15, 16  ;;  %v568_v25 = vrot.slane %v1237_v15, 2  ;;  %v609_v26 = vrot.slane %v1237_v15, 3  ;;  %v527_v30 = vrot.slane %v1237_v15, 1 }
  0xa8   :  { %238 = vrot.lane.b32.xlu1 %v195_v17, %s1068_s5  ;;  %821 = vmatmul.msk.bf16.vlgmr.msrb.gmra.mxu0 %vm221_vm2, %v195_v17  ;;  %v351_v18 = vrot.slane %v195_v17, 2  ;;  %v274_v19 = vrot.slane %v195_v17, 1  ;;  %v428_v24 = vrot.slane %v195_v17, 3 }
  0xa9   :  { %518 = vmatpush.bf16.msrb.mxu0 %v1008_v16 }
  0xaa   :  { %392 = vrot.lane.b32.xlu2 %v351_v18, %s1068_s5  ;;  %315 = vrot.lane.b32.xlu0 %v274_v19, %s1068_s5 }
  0xab   :  { %855 = vmatmul.msk.bf16.vlgmr.msrb.gmra.mxu2 %vm221_vm2, %v274_v19 }
  0xac   :  { %600 = vmatpush.bf16.msrb.mxu2 %v1024_v20 }
  0xad   :  { %519 = vmatpush.bf16.msrb.mxu0 %v1007_v21 }
  0xb0   :  { %469 = vrot.lane.b32.xlu1 %v428_v24, %s1068_s5  ;;  %601 = vmatpush.bf16.msrb.mxu2 %v1023_v22 }
  0xb1   :  { %520 = vmatpush.bf16.msrb.mxu0 %v1006_v23 }
  0xb2   :  { %691 = vrot.lane.b32.xlu2 %v568_v25, %s1068_s5  ;;  %709 = vrot.lane.b32.xlu0 %v609_v26, %s1068_s5 }
  0xb4   :  { %602 = vmatpush.bf16.msrb.mxu2 %v1022_v27 }
  0xb5   :  { %521 = vmatpush.bf16.msrb.mxu0 %v1005_v28 }
  0xb8   :  { %655 = vrot.lane.b32.xlu1 %v1237_v15, %s1068_s5  ;;  %889 = vmatmul.msk.bf16.vlgmr.msra.gmra.mxu0 %vm221_vm2, %v351_v18 }
  0xb9   :  { %603 = vmatpush.bf16.msrb.mxu2 %v1021_v29  ;;  %664 = vmatpush.bf16.msra.mxu0 %v1008_v16 }
  0xba   :  { %673 = vrot.lane.b32.xlu2 %v527_v30, %s1068_s5 }
  0xbb   :  { %923 = vmatmul.msk.bf16.vlgmr.msra.gmra.mxu2 %vm221_vm2, %v428_v24 }
  0xbd   :  { %700 = vmatpush.bf16.msra.mxu2 %v1024_v20  ;;  %665 = vmatpush.bf16.msra.mxu0 %v1007_v21 }
  0xc1   :  { %701 = vmatpush.bf16.msra.mxu2 %v1023_v22  ;;  %666 = vmatpush.bf16.msra.mxu0 %v1006_v23 }
  0xc5   :  { %702 = vmatpush.bf16.msra.mxu2 %v1022_v27  ;;  %667 = vmatpush.bf16.msra.mxu0 %v1005_v28  ;;  %v653_v28 = vld [vmem:[%s1330_s4] sm:$0x1] }
  0xc8   :  { %941 = vmatmul.msk.bf16.vlgmr.msrb.gmra.mxu0 %vm221_vm2, %v173_v13 }
  0xc9   :  { %703 = vmatpush.bf16.msra.mxu2 %v1021_v29 }
  0xcb   :  { %975 = vmatmul.msk.bf16.vlgmr.msrb.gmra.mxu2 %vm221_vm2, %v568_v25 }
 0x104   :  { %v393_v31 = vpop.permute.xlu2 %392 }
 0x10c   :  { %v692_v32 = vpop.permute.xlu2 %691 }
 0x10d   :  { %995 = vmatmul.msk.bf16.vlgmr.msra.gmra.mxu2 %vm221_vm2, %v692_v32 }
 0x114   :  { %v674_v55 = vpop.permute.xlu2 %673 }
 0x11a   :  { %v239_v34 = vpop.permute.xlu1 %238 }
 0x11b   :  { %822 = vmatmul.msk.bf16.vlgmr.msrb.gmra.mxu1 %vm221_vm2, %v239_v34 }
 0x11c   :  { %v316_v36 = vpop.permute.xlu0 %315  ;;  %559 = vmatpush.bf16.msrb.mxu1 %v1016_v33 }
 0x11d   :  { %856 = vmatmul.msk.bf16.vlgmr.msrb.gmra.mxu3 %vm221_vm2, %v316_v36 }
 0x11e   :  { %641 = vmatpush.bf16.msrb.mxu3 %v1032_v35 }
 0x120   :  { %560 = vmatpush.bf16.msrb.mxu1 %v1015_v37 }
 0x122   :  { %v470_v40 = vpop.permute.xlu1 %469  ;;  %642 = vmatpush.bf16.msrb.mxu3 %v1031_v38 }
 0x124   :  { %561 = vmatpush.bf16.msrb.mxu1 %v1014_v39  ;;  %v710_v56 = vpop.permute.xlu0 %709 }
 0x125   :  { %v234_v43 = vpop.f32.mrf.mxu0 }
 0x126   :  { %643 = vmatpush.bf16.msrb.mxu3 %v1030_v41 }
 0x128   :  { %562 = vmatpush.bf16.msrb.mxu1 %v1013_v42 }
 0x12a   :  { %v656_v45 = vpop.permute.xlu1 %655  ;;  %644 = vmatpush.bf16.msrb.mxu3 %v1029_v44 }
 0x12b   :  { %890 = vmatmul.msk.bf16.vlgmr.msra.gmra.mxu1 %vm221_vm2, %v393_v31  ;;  %993 = vmatmul.msk.bf16.vlgmr.msra.gmra.mxu0 %vm221_vm2, %v656_v45 }
 0x12c   :  { %682 = vmatpush.bf16.msra.mxu1 %v1016_v33 }
 0x12d   :  { %v236_v46 = vpop.f32.mrf.mxu0  ;;  %924 = vmatmul.msk.bf16.vlgmr.msra.gmra.mxu3 %vm221_vm2, %v470_v40 }
 0x12e   :  { %v311_v47 = vpop.f32.mrf.mxu2  ;;  %718 = vmatpush.bf16.msra.mxu3 %v1032_v35 }
 0x130   :  { %683 = vmatpush.bf16.msra.mxu1 %v1015_v37 }
 0x132   :  { %719 = vmatpush.bf16.msra.mxu3 %v1031_v38 }
 0x134   :  { %684 = vmatpush.bf16.msra.mxu1 %v1014_v39 }
 0x135   :  { %v388_v48 = vpop.f32.mrf.mxu0 }
 0x136   :  { %v313_v49 = vpop.f32.mrf.mxu2  ;;  %720 = vmatpush.bf16.msra.mxu3 %v1030_v41 }
 0x138   :  { %685 = vmatpush.bf16.msra.mxu1 %v1013_v42 }
 0x13a   :  { %721 = vmatpush.bf16.msra.mxu3 %v1029_v44 }
 0x13b   :  { %958 = vmatmul.msk.bf16.vlgmr.msrb.gmra.mxu1 %vm221_vm2, %v527_v30 }
 0x13d   :  { %v390_v50 = vpop.f32.mrf.mxu0  ;;  %992 = vmatmul.msk.bf16.vlgmr.msrb.gmra.mxu3 %vm221_vm2, %v609_v26 }
 0x13e   :  { %v465_v51 = vpop.f32.mrf.mxu2 }
 0x145   :  { %v523_v52 = vpop.f32.mrf.mxu0 }
 0x146   :  { %v467_v53 = vpop.f32.mrf.mxu2  ;;  %v524_v54 = vadd.f32 %v523_v52, %v234_v43 }
 0x14b   :  { %994 = vmatmul.msk.bf16.vlgmr.msra.gmra.mxu1 %vm221_vm2, %v674_v55 }
 0x14d   :  { %v525_v57 = vpop.f32.mrf.mxu0  ;;  %996 = vmatmul.msk.bf16.vlgmr.msra.gmra.mxu3 %vm221_vm2, %v710_v56 }
 0x14e   :  { %v605_v58 = vpop.f32.mrf.mxu2 }
 0x14f   :  { %v606_v59 = vadd.f32 %v605_v58, %v388_v48 }
 0x156   :  { %v607_v60 = vpop.f32.mrf.mxu2 }
 0x190   :  { %v705_v61 = vpop.f32.mrf.mxu2 }
 0x198   :  { %v252_v62 = vpop.f32.mrf.mxu1  ;;  %v707_v63 = vpop.f32.mrf.mxu2 }
 0x1a0   :  { %v254_v0 = vpop.f32.mrf.mxu1  ;;  %v329_v1 = vpop.f32.mrf.mxu3 }
 0x1a8   :  { %v331_v2 = vpop.f32.mrf.mxu3  ;;  %v406_v3 = vpop.f32.mrf.mxu1 }
 0x1a9   :  { %v669_v4 = vpop.f32.mrf.mxu0  ;;  %v706_v22 = vadd.f32 %v705_v61, %v406_v3 }
 0x1aa   :  { %v670_v23 = vadd.f32 %v669_v4, %v252_v62 }
 0x1b0   :  { %v408_v5 = vpop.f32.mrf.mxu1  ;;  %v483_v6 = vpop.f32.mrf.mxu3 }
 0x1b1   :  { %v671_v7 = vpop.f32.mrf.mxu0 }
 0x1b8   :  { %v485_v8 = vpop.f32.mrf.mxu3  ;;  %v564_v9 = vpop.f32.mrf.mxu1 }
 0x1b9   :  { %v565_v10 = vadd.f32 %v564_v9, %v311_v47 }
 0x1bb   :  { %v650_v14 = vadd.f32 %v565_v10, %v524_v54 }
 0x1c0   :  { %v566_v11 = vpop.f32.mrf.mxu1  ;;  %v646_v12 = vpop.f32.mrf.mxu3 }
 0x1c1   :  { %v647_v13 = vadd.f32 %v646_v12, %v465_v51 }
 0x1c3   :  { %v651_v15 = vadd.f32 %v647_v13, %v606_v59 }
 0x1c5   :  { %v652_v16 = vadd.f32 %v651_v15, %v650_v14 }
 0x1c7   :  { %v654_v31 = vadd.f32 %v653_v28, %v652_v16 }
 0x1c8   :  { %v648_v17 = vpop.f32.mrf.mxu3  ;;  %v687_v18 = vpop.f32.mrf.mxu1 }
 0x1c9   :  { %v688_v19 = vadd.f32 %v687_v18, %v329_v1 }
 0x1cb   :  { %v727_v25 = vadd.f32 %v688_v19, %v670_v23 }
 0x1d0   :  { %v689_v20 = vpop.f32.mrf.mxu1  ;;  %v723_v21 = vpop.f32.mrf.mxu3 }
 0x1d1   :  { %v724_v24 = vadd.f32 %v723_v21, %v483_v6 }
 0x1d3   :  { %v728_v26 = vadd.f32 %v724_v24, %v706_v22 }
 0x1d5   :  { %v729_v27 = vadd.f32 %v728_v26, %v727_v25 }
 0x1d7   :  { %v730_v29 = vadd.f32 %v729_v27, %v653_v28 }
 0x1d8   :  { %v725_v30 = vpop.f32.mrf.mxu3 }
 0x1d9   :  { %v732_v32 = vrot.slane %v730_v29, 7 }
 0x1db   :  { %v735_v33 = vsel %vm734_vm3, %v654_v31, %v732_v32 }
 0x1dc   :  { %736 = vst [vmem:[#allocation2] sm:$0x3] %v735_v33 }
 0x1dd   :  { %751 = dma.vmem_to_hbm [thread:$0]  %s747_s13, 32, %s749_s2, [#allocation3]  }
 0x1de   :  { %1065 = dma.done.wait [#allocation3], 32  }
 0x1df   :  { %1066 = vsyncadd [#allocation3], 4294967264 }
 0x1e0   :  { %760 = vsyncpa [#allocation3], 1 }

</bundles_post_ra>
